<compile_context>
chip_gen: v7x
topology: tpu7x:2x2x1
jax: 0.10.0
libtpu: 0.0.40
codegen_flags: <defaults>
</compile_context>

<pallas_src>
import functools
import math

import jax
import jax.numpy as jnp
from jax.experimental import pallas as pl
from jax.experimental.pallas import tpu as pltpu


_SQRT_2_OVER_PI = math.sqrt(2.0 / math.pi)
_LN_EPS = 1e-5  # torch.nn.LayerNorm default


def _gelu_tanh(x):
    return 0.5 * x * (1.0 + jnp.tanh(_SQRT_2_OVER_PI * (x + 0.044715 * x * x * x)))


def _layer_norm(x, gamma, beta, eps):
    mu = jnp.mean(x, axis=-1, keepdims=True)
    xc = x - mu
    var = jnp.mean(xc * xc, axis=-1, keepdims=True)
    return xc * jax.lax.rsqrt(var + eps) * gamma + beta


def _encoder_kernel(
    x_ref,                       # (1, N, D)   original input (read only at layer 0)
    ln1_g_ref, ln1_b_ref,        # (1, 1, D)   f32
    wqkv_ref,                    # (1, D, 3*inner)  bf16
    wout_ref, bout_ref,          # (1, inner, D) bf16, (1, 1, D) f32
    ln2_g_ref, ln2_b_ref,        # (1, 1, D)   f32
    w1_ref, b1_ref,              # (1, D, mlp) bf16, (1, 1, mlp) f32
    w2_ref, b2_ref,              # (1, mlp, D) bf16, (1, 1, D) f32
    o_ref,                       # (1, N, D)   resident carry across the layer axis
    attn_scratch,                # (N, inner)  f32 VMEM scratch (head concat)
    *, heads, dim_head, eps,
):
    layer = pl.program_id(1)
    inner = heads * dim_head
    scale = float(dim_head) ** -0.5

    # Layer 0: seed the resident carry with the input block.
    @pl.when(layer == 0)
    def _():
        o_ref[...] = x_ref[...]

    x = o_ref[0].astype(jnp.float32)                                  # (N, D)

    # ---- PreNorm + multi-head self-attention + residual --------------------
    h = _layer_norm(x, ln1_g_ref[0].astype(jnp.float32),
                    ln1_b_ref[0].astype(jnp.float32), eps)            # (N, D) f32
    qkv = jnp.dot(h.astype(jnp.bfloat16), wqkv_ref[0],
                  preferred_element_type=jnp.float32)                 # (N, 3*inner) f32

    def split_heads(t):                                               # (N, inner) -> (heads, N, dh)
        return jnp.stack(
            [t[:, hd * dim_head:(hd + 1) * dim_head] for hd in range(heads)], axis=0)

    q = split_heads(qkv[:, :inner])
    k = split_heads(qkv[:, inner:2 * inner])
    v = split_heads(qkv[:, 2 * inner:])

    # Head-batched scores + softmax (f32) + weighted sum.
    s = jnp.einsum('hnd,hmd->hnm', q, k,
                   preferred_element_type=jnp.float32) * scale        # (heads, N, N)
    s = s - jnp.max(s, axis=-1, keepdims=True)
    p = jnp.exp(s)
    p = p * pl.reciprocal(jnp.sum(p, axis=-1, keepdims=True), approx=True)
    o_att = jnp.einsum('hnm,hmd->hnd', p, v,
                       preferred_element_type=jnp.float32)            # (heads, N, dh)

    # Concat heads into a lane-contiguous (N, inner) scratch, then one deep matmul.
    for hd in range(heads):
        attn_scratch[:, hd * dim_head:(hd + 1) * dim_head] = o_att[hd]
    proj = jnp.dot(attn_scratch[...].astype(jnp.bfloat16), wout_ref[0],
                   preferred_element_type=jnp.float32)                # (N, D)
    x = x + proj + bout_ref[0].astype(jnp.float32)

    # ---- PreNorm + FeedForward (Linear -> GELU -> Linear) + residual -------
    h = _layer_norm(x, ln2_g_ref[0].astype(jnp.float32),
                    ln2_b_ref[0].astype(jnp.float32), eps)
    h = jnp.dot(h.astype(jnp.bfloat16), w1_ref[0],
                preferred_element_type=jnp.float32) + b1_ref[0].astype(jnp.float32)
    h = _gelu_tanh(h)
    h = jnp.dot(h.astype(jnp.bfloat16), w2_ref[0],
                preferred_element_type=jnp.float32) + b2_ref[0].astype(jnp.float32)

    o_ref[0] = (x + h).astype(o_ref.dtype)


def _vmem_budget_bytes(N, D, inner, mlp, heads):
    bf16, f32 = 2, 4
    weights = (D * 3 * inner + inner * D + D * mlp + mlp * D) * bf16
    small = (6 * D + mlp) * f32
    blocks_io = 2 * N * D * f32
    acts = (N * 3 * inner + 3 * inner * N + heads * N * N + N * mlp + 6 * N * D) * f32
    scratch = N * inner * f32
    # Weights/biases are double-buffered by the pipeline (next layer prefetched).
    return 2 * (weights + small) + 2 * blocks_io + acts + scratch


def transformer_encoder(x, params, *, heads, dim_head, eps=_LN_EPS):
    """Full TransformerEncoder forward as ONE fused pallas_call (grid = batch x layer)."""
    B, N, D = x.shape
    depth = len(params)
    inner = heads * dim_head
    mlp = params[0][7].shape[1]

    # Stack per-layer weights along a leading depth axis; matmul weights in bf16.
    def stack(idx, dtype):
        return jnp.stack([p[idx] for p in params], axis=0).astype(dtype)

    ln1_g = stack(0, jnp.float32)
    ln1_b = stack(1, jnp.float32)
    wqkv = stack(2, jnp.bfloat16)
    wout = stack(3, jnp.bfloat16)
    bout = stack(4, jnp.float32)
    ln2_g = stack(5, jnp.float32)
    ln2_b = stack(6, jnp.float32)
    w1 = stack(7, jnp.bfloat16)
    b1 = stack(8, jnp.float32)
    w2 = stack(9, jnp.bfloat16)
    b2 = stack(10, jnp.float32)

    # VMEM budget: actual footprint + headroom, capped to the device's physical VMEM.
    needed = _vmem_budget_bytes(N, D, inner, mlp, heads) + (4 << 20)
    try:
        phys = int(pltpu.get_tpu_info().vmem_capacity_bytes)
    except Exception:
        phys = 64 << 20
    vmem_limit = max(16 << 20, min(needed, int(phys * 0.9)))

    kernel = functools.partial(_encoder_kernel, heads=heads, dim_head=dim_head, eps=eps)

    def x_map(b, l):
        return (b, 0, 0)          # constant across layers -> resident / carried

    def w_map(b, l):
        return (l, 0, 0)          # layer-indexed -> next layer prefetched under compute

    in_specs = [
        pl.BlockSpec((1, N, D), x_map),                 # x
        pl.BlockSpec((1, 1, D), w_map),                 # ln1 gamma
        pl.BlockSpec((1, 1, D), w_map),                 # ln1 beta
        pl.BlockSpec((1, D, 3 * inner), w_map),         # Wqkv (bf16)
        pl.BlockSpec((1, inner, D), w_map),             # Wout (bf16)
        pl.BlockSpec((1, 1, D), w_map),                 # bout
        pl.BlockSpec((1, 1, D), w_map),                 # ln2 gamma
        pl.BlockSpec((1, 1, D), w_map),                 # ln2 beta
        pl.BlockSpec((1, D, mlp), w_map),               # W1 (bf16)
        pl.BlockSpec((1, 1, mlp), w_map),               # b1
        pl.BlockSpec((1, mlp, D), w_map),               # W2 (bf16)
        pl.BlockSpec((1, 1, D), w_map),                 # b2
    ]
    out_specs = pl.BlockSpec((1, N, D), x_map)

    return pl.pallas_call(
        kernel,
        out_shape=jax.ShapeDtypeStruct((B, N, D), x.dtype),
        grid_spec=pltpu.PrefetchScalarGridSpec(
            num_scalar_prefetch=0,
            grid=(B, depth),
            in_specs=in_specs,
            out_specs=out_specs,
            scratch_shapes=[pltpu.VMEM((N, inner), jnp.float32)],
        ),
        compiler_params=pltpu.CompilerParams(
            dimension_semantics=("parallel", "arbitrary"),
            vmem_limit_bytes=vmem_limit,
        ),
    )(x, ln1_g, ln1_b, wqkv, wout, bout, ln2_g, ln2_b, w1, b1, w2, b2)


def init_params(key, depth, dim, heads, dim_head, mlp_dim):
    """Deterministic stand-in for the PyTorch parameters (weights as (in, out))."""
    inner = heads * dim_head
    project_out = not (heads == 1 and dim_head == dim)
    params = []
    for _ in range(depth):
        key, *ks = jax.random.split(key, 10)
        ln1_g = 1.0 + 0.1 * jax.random.normal(ks[0], (1, dim), jnp.float32)
        ln1_b = 0.1 * jax.random.normal(ks[1], (1, dim), jnp.float32)
        wqkv = 0.02 * jax.random.normal(ks[2], (dim, 3 * inner), jnp.float32)
        if project_out:
            wout = 0.02 * jax.random.normal(ks[3], (inner, dim), jnp.float32)
            bout = 0.02 * jax.random.normal(ks[4], (1, dim), jnp.float32)
        else:  # nn.Identity() case: equivalent identity projection
            wout = jnp.eye(dim, dtype=jnp.float32)
            bout = jnp.zeros((1, dim), jnp.float32)
        ln2_g = 1.0 + 0.1 * jax.random.normal(ks[5], (1, dim), jnp.float32)
        ln2_b = 0.1 * jax.random.normal(ks[6], (1, dim), jnp.float32)
        w1 = 0.02 * jax.random.normal(ks[7], (dim, mlp_dim), jnp.float32)
        b1 = 0.02 * jax.random.normal(ks[8], (1, mlp_dim), jnp.float32)
        key, k9, k10 = jax.random.split(key, 3)
        w2 = 0.02 * jax.random.normal(k9, (mlp_dim, dim), jnp.float32)
        b2 = 0.02 * jax.random.normal(k10, (1, dim), jnp.float32)
        params.append((ln1_g, ln1_b, wqkv, wout, bout, ln2_g, ln2_b, w1, b1, w2, b2))
    return params


def _reference_encoder(x, params, *, heads, dim_head, eps=_LN_EPS):
    """Pure-JAX mirror of the PyTorch forward.

    Matmul weights are rounded to bf16 (as stored by the kernel) so the comparison
    isolates kernel bugs rather than the weight-quantization choice; math stays f32.
    """
    hp = jax.lax.Precision.HIGHEST
    rnd = lambda w: w.astype(jnp.bfloat16).astype(jnp.float32)
    inner = heads * dim_head
    scale = float(dim_head) ** -0.5
    B, N, _ = x.shape
    for (ln1_g, ln1_b, wqkv, wout, bout, ln2_g, ln2_b, w1, b1, w2, b2) in params:
        h = _layer_norm(x, ln1_g, ln1_b, eps)
        qkv = jnp.einsum('bnd,df->bnf', h, rnd(wqkv), precision=hp)
        q, k, v = jnp.split(qkv, 3, axis=-1)
        q = q.reshape(B, N, heads, dim_head).transpose(0, 2, 1, 3)
        k = k.reshape(B, N, heads, dim_head).transpose(0, 2, 1, 3)
        v = v.reshape(B, N, heads, dim_head).transpose(0, 2, 1, 3)
        s = jnp.einsum('bhnd,bhmd->bhnm', q, k, precision=hp) * scale
        p = jax.nn.softmax(s, axis=-1)
        o = jnp.einsum('bhnm,bhmd->bhnd', p, v, precision=hp)
        o = o.transpose(0, 2, 1, 3).reshape(B, N, inner)
        o = jnp.einsum('bnf,fd->bnd', o, rnd(wout), precision=hp) + bout
        x = x + o
        h = _layer_norm(x, ln2_g, ln2_b, eps)
        h = jnp.einsum('bnd,dm->bnm', h, rnd(w1), precision=hp) + b1
        h = _gelu_tanh(h)
        h = jnp.einsum('bnm,md->bnd', h, rnd(w2), precision=hp) + b2
        x = x + h
    return x


if __name__ == "__main__":
    # Small shapes consistent with the module: batch=2, seq=8, dim=32,
    # depth=2 layers, 4 heads of dim 8 (inner=32), mlp_dim=64.
    B, N, DIM = 2, 8, 32
    DEPTH, HEADS, DIM_HEAD, MLP_DIM = 2, 4, 8, 64

    key = jax.random.PRNGKey(0)
    kx, kp = jax.random.split(key)
    x = jax.random.normal(kx, (B, N, DIM), dtype=jnp.float32)
    params = init_params(kp, DEPTH, DIM, HEADS, DIM_HEAD, MLP_DIM)

    fwd = jax.jit(functools.partial(transformer_encoder, heads=HEADS, dim_head=DIM_HEAD))
    out = jax.block_until_ready(fwd(x, params))

    ref = _reference_encoder(x, params, heads=HEADS, dim_head=DIM_HEAD)
    assert out.shape == (B, N, DIM)
    max_err = float(jnp.max(jnp.abs(out - ref)))
    assert jnp.allclose(out, ref, atol=3e-3, rtol=3e-3), max_err

    print("KERNEL_OK")
</pallas_src>

<mosaic_0001>
module attributes {stable_mosaic.version = 11 : i64} {
  func.func @_encoder_kernel(%arg0: i32, %arg1: i32, %arg2: memref<1x8x32xf32, #tpu.memory_space<vmem>>, %arg3: memref<1x1x32xf32, #tpu.memory_space<vmem>>, %arg4: memref<1x1x32xf32, #tpu.memory_space<vmem>>, %arg5: memref<1x32x96xbf16, #tpu.memory_space<vmem>>, %arg6: memref<1x32x32xbf16, #tpu.memory_space<vmem>>, %arg7: memref<1x1x32xf32, #tpu.memory_space<vmem>>, %arg8: memref<1x1x32xf32, #tpu.memory_space<vmem>>, %arg9: memref<1x1x32xf32, #tpu.memory_space<vmem>>, %arg10: memref<1x32x64xbf16, #tpu.memory_space<vmem>>, %arg11: memref<1x1x64xf32, #tpu.memory_space<vmem>>, %arg12: memref<1x64x32xbf16, #tpu.memory_space<vmem>>, %arg13: memref<1x1x32xf32, #tpu.memory_space<vmem>>, %arg14: memref<1x8x32xf32, #tpu.memory_space<vmem>>, %arg15: memref<8x32xf32, #tpu.memory_space<vmem>>) attributes {dimension_semantics = [#tpu.dimension_semantics<parallel>, #tpu.dimension_semantics<arbitrary>], iteration_bounds = array<i64: 2, 2>, scalar_prefetch = 0 : i64, scratch_operands = 1 : i64, tpu.core_type = #tpu.core_type<tc>, window_params = [{transform_indices = @transform_0, window_bounds = array<i64: 1, 8, 32>}, {transform_indices = @transform_1, window_bounds = array<i64: 1, 1, 32>}, {transform_indices = @transform_2, window_bounds = array<i64: 1, 1, 32>}, {transform_indices = @transform_3, window_bounds = array<i64: 1, 32, 96>}, {transform_indices = @transform_4, window_bounds = array<i64: 1, 32, 32>}, {transform_indices = @transform_5, window_bounds = array<i64: 1, 1, 32>}, {transform_indices = @transform_6, window_bounds = array<i64: 1, 1, 32>}, {transform_indices = @transform_7, window_bounds = array<i64: 1, 1, 32>}, {transform_indices = @transform_8, window_bounds = array<i64: 1, 32, 64>}, {transform_indices = @transform_9, window_bounds = array<i64: 1, 1, 64>}, {transform_indices = @transform_10, window_bounds = array<i64: 1, 64, 32>}, {transform_indices = @transform_11, window_bounds = array<i64: 1, 1, 32>}, {transform_indices = @transform_12, window_bounds = array<i64: 1, 8, 32>}]} {
    %c0_i32 = arith.constant 0 : i32
    %0 = arith.cmpi eq, %arg1, %c0_i32 : i32
    %1 = arith.extui %0 : i1 to i32
    %c0_i32_0 = arith.constant 0 : i32
    %2 = arith.cmpi ne, %1, %c0_i32_0 : i32
    scf.if %2 {
      %c0_68 = arith.constant 0 : index
      %c0_69 = arith.constant 0 : index
      %c0_70 = arith.constant 0 : index
      %156 = vector.load %arg2[%c0_68, %c0_69, %c0_70] : memref<1x8x32xf32, #tpu.memory_space<vmem>>, vector<1x8x32xf32>
      %c0_71 = arith.constant 0 : index
      %c0_72 = arith.constant 0 : index
      %c0_73 = arith.constant 0 : index
      %157 = vector.load %arg14[%c0_71, %c0_72, %c0_73] : memref<1x8x32xf32, #tpu.memory_space<vmem>>, vector<1x8x32xf32>
      tpu.vector_store %arg14[%c0_71, %c0_72, %c0_73], %156 {strides = array<i32>} : memref<1x8x32xf32, #tpu.memory_space<vmem>>, vector<1x8x32xf32>,
    } else {
    }
    %c0 = arith.constant 0 : index
    %c0_1 = arith.constant 0 : index
    %c0_2 = arith.constant 0 : index
    %3 = vector.load %arg14[%c0, %c0_1, %c0_2] : memref<1x8x32xf32, #tpu.memory_space<vmem>>, vector<1x8x32xf32>
    %4 = vector.shape_cast %3 : vector<1x8x32xf32> to vector<8x32xf32>
    %c0_3 = arith.constant 0 : index
    %c0_4 = arith.constant 0 : index
    %c0_5 = arith.constant 0 : index
    %5 = vector.load %arg3[%c0_3, %c0_4, %c0_5] : memref<1x1x32xf32, #tpu.memory_space<vmem>>, vector<1x1x32xf32>
    %6 = vector.shape_cast %5 : vector<1x1x32xf32> to vector<1x32xf32>
    %c0_6 = arith.constant 0 : index
    %c0_7 = arith.constant 0 : index
    %c0_8 = arith.constant 0 : index
    %7 = vector.load %arg4[%c0_6, %c0_7, %c0_8] : memref<1x1x32xf32, #tpu.memory_space<vmem>>, vector<1x1x32xf32>
    %8 = vector.shape_cast %7 : vector<1x1x32xf32> to vector<1x32xf32>
    %cst = arith.constant dense<0.000000e+00> : vector<8xf32>
    %9 = vector.multi_reduction <add>, %4, %cst [1] : vector<8x32xf32> to vector<8xf32>
    %10 = vector.shape_cast %9 : vector<8xf32> to vector<8x1xf32>
    %cst_9 = arith.constant 3.200000e+01 : f32
    %11 = vector.broadcast %cst_9 : f32 to vector<8x1xf32>
    %12 = arith.divf %10, %11 : vector<8x1xf32>
    %13 = vector.broadcast %12 : vector<8x1xf32> to vector<8x32xf32>
    %14 = arith.subf %4, %13 : vector<8x32xf32>
    %15 = arith.mulf %14, %14 : vector<8x32xf32>
    %cst_10 = arith.constant dense<0.000000e+00> : vector<8xf32>
    %16 = vector.multi_reduction <add>, %15, %cst_10 [1] : vector<8x32xf32> to vector<8xf32>
    %17 = vector.shape_cast %16 : vector<8xf32> to vector<8x1xf32>
    %cst_11 = arith.constant 3.200000e+01 : f32
    %18 = vector.broadcast %cst_11 : f32 to vector<8x1xf32>
    %19 = arith.divf %17, %18 : vector<8x1xf32>
    %cst_12 = arith.constant 9.99999974E-6 : f32
    %20 = vector.broadcast %cst_12 : f32 to vector<8x1xf32>
    %21 = arith.addf %19, %20 : vector<8x1xf32>
    %22 = math.rsqrt %21 : vector<8x1xf32>
    %23 = vector.broadcast %22 : vector<8x1xf32> to vector<8x32xf32>
    %24 = arith.mulf %14, %23 : vector<8x32xf32>
    %25 = vector.broadcast %6 : vector<1x32xf32> to vector<8x32xf32>
    %26 = arith.mulf %24, %25 : vector<8x32xf32>
    %27 = vector.broadcast %8 : vector<1x32xf32> to vector<8x32xf32>
    %28 = arith.addf %26, %27 : vector<8x32xf32>
    %29 = arith.truncf %28 : vector<8x32xf32> to vector<8x32xbf16>
    %c0_13 = arith.constant 0 : index
    %c0_14 = arith.constant 0 : index
    %c0_15 = arith.constant 0 : index
    %30 = vector.load %arg5[%c0_13, %c0_14, %c0_15] : memref<1x32x96xbf16, #tpu.memory_space<vmem>>, vector<1x32x96xbf16>
    %31 = vector.shape_cast %30 : vector<1x32x96xbf16> to vector<32x96xbf16>
    %cst_16 = arith.constant dense<0.000000e+00> : vector<8x96xf32>
    %32 = tpu.matmul %29, %31, %cst_16 {dimension_numbers = #tpu.dot_dimension_numbers<[1], [0], [0], [1], [0, 0, 1, 1], [], []>} : vector<8x32xbf16>, vector<32x96xbf16>, vector<8x96xf32> -> vector<8x96xf32>
    %33 = vector.extract_strided_slice %32 {offsets = [0, 0], sizes = [8, 32], strides = [1, 1]} : vector<8x96xf32> to vector<8x32xf32>
    %34 = vector.extract_strided_slice %33 {offsets = [0, 0], sizes = [8, 8], strides = [1, 1]} : vector<8x32xf32> to vector<8x8xf32>
    %35 = vector.extract_strided_slice %33 {offsets = [0, 8], sizes = [8, 8], strides = [1, 1]} : vector<8x32xf32> to vector<8x8xf32>
    %36 = vector.extract_strided_slice %33 {offsets = [0, 16], sizes = [8, 8], strides = [1, 1]} : vector<8x32xf32> to vector<8x8xf32>
    %37 = vector.extract_strided_slice %33 {offsets = [0, 24], sizes = [8, 8], strides = [1, 1]} : vector<8x32xf32> to vector<8x8xf32>
    %38 = vector.shape_cast %34 : vector<8x8xf32> to vector<1x8x8xf32>
    %39 = vector.shape_cast %35 : vector<8x8xf32> to vector<1x8x8xf32>
    %40 = vector.shape_cast %36 : vector<8x8xf32> to vector<1x8x8xf32>
    %41 = vector.shape_cast %37 : vector<8x8xf32> to vector<1x8x8xf32>
    %42 = tpu.concatenate %38, %39, %40, %41 in 0 : vector<1x8x8xf32>, vector<1x8x8xf32>, vector<1x8x8xf32>, vector<1x8x8xf32> -> vector<4x8x8xf32>
    %43 = vector.extract_strided_slice %32 {offsets = [0, 32], sizes = [8, 32], strides = [1, 1]} : vector<8x96xf32> to vector<8x32xf32>
    %44 = vector.extract_strided_slice %43 {offsets = [0, 0], sizes = [8, 8], strides = [1, 1]} : vector<8x32xf32> to vector<8x8xf32>
    %45 = vector.extract_strided_slice %43 {offsets = [0, 8], sizes = [8, 8], strides = [1, 1]} : vector<8x32xf32> to vector<8x8xf32>
    %46 = vector.extract_strided_slice %43 {offsets = [0, 16], sizes = [8, 8], strides = [1, 1]} : vector<8x32xf32> to vector<8x8xf32>
    %47 = vector.extract_strided_slice %43 {offsets = [0, 24], sizes = [8, 8], strides = [1, 1]} : vector<8x32xf32> to vector<8x8xf32>
    %48 = vector.shape_cast %44 : vector<8x8xf32> to vector<1x8x8xf32>
    %49 = vector.shape_cast %45 : vector<8x8xf32> to vector<1x8x8xf32>
    %50 = vector.shape_cast %46 : vector<8x8xf32> to vector<1x8x8xf32>
    %51 = vector.shape_cast %47 : vector<8x8xf32> to vector<1x8x8xf32>
    %52 = tpu.concatenate %48, %49, %50, %51 in 0 : vector<1x8x8xf32>, vector<1x8x8xf32>, vector<1x8x8xf32>, vector<1x8x8xf32> -> vector<4x8x8xf32>
    %53 = vector.extract_strided_slice %32 {offsets = [0, 64], sizes = [8, 32], strides = [1, 1]} : vector<8x96xf32> to vector<8x32xf32>
    %54 = vector.extract_strided_slice %53 {offsets = [0, 0], sizes = [8, 8], strides = [1, 1]} : vector<8x32xf32> to vector<8x8xf32>
    %55 = vector.extract_strided_slice %53 {offsets = [0, 8], sizes = [8, 8], strides = [1, 1]} : vector<8x32xf32> to vector<8x8xf32>
    %56 = vector.extract_strided_slice %53 {offsets = [0, 16], sizes = [8, 8], strides = [1, 1]} : vector<8x32xf32> to vector<8x8xf32>
    %57 = vector.extract_strided_slice %53 {offsets = [0, 24], sizes = [8, 8], strides = [1, 1]} : vector<8x32xf32> to vector<8x8xf32>
    %58 = vector.shape_cast %54 : vector<8x8xf32> to vector<1x8x8xf32>
    %59 = vector.shape_cast %55 : vector<8x8xf32> to vector<1x8x8xf32>
    %60 = vector.shape_cast %56 : vector<8x8xf32> to vector<1x8x8xf32>
    %61 = vector.shape_cast %57 : vector<8x8xf32> to vector<1x8x8xf32>
    %62 = tpu.concatenate %58, %59, %60, %61 in 0 : vector<1x8x8xf32>, vector<1x8x8xf32>, vector<1x8x8xf32>, vector<1x8x8xf32> -> vector<4x8x8xf32>
    "tpu.trace_start"() <{level = 10 : i32, message = "hnd,hmd->hnm"}> : () -> ()
    %cst_17 = arith.constant dense<0.000000e+00> : vector<4x8x8xf32>
    %63 = tpu.matmul %42, %52, %cst_17 {dimension_numbers = #tpu.dot_dimension_numbers<[2], [2], [1], [1], [0, 0, 0, 1, 1, 1], [0], [0]>} : vector<4x8x8xf32>, vector<4x8x8xf32>, vector<4x8x8xf32> -> vector<4x8x8xf32>
    "tpu.trace_stop"() : () -> ()
    %cst_18 = arith.constant 0.353553385 : f32
    %64 = vector.broadcast %cst_18 : f32 to vector<4x8x8xf32>
    %65 = arith.mulf %63, %64 : vector<4x8x8xf32>
    %cst_19 = arith.constant dense<0xFF800000> : vector<4x8xf32>
    %66 = vector.multi_reduction <maximumf>, %65, %cst_19 [2] : vector<4x8x8xf32> to vector<4x8xf32>
    %67 = vector.shape_cast %66 : vector<4x8xf32> to vector<4x8x1xf32>
    %68 = vector.broadcast %67 : vector<4x8x1xf32> to vector<4x8x8xf32>
    %69 = arith.subf %65, %68 : vector<4x8x8xf32>
    %70 = math.exp %69 : vector<4x8x8xf32>
    %cst_20 = arith.constant dense<0.000000e+00> : vector<4x8xf32>
    %71 = vector.multi_reduction <add>, %70, %cst_20 [2] : vector<4x8x8xf32> to vector<4x8xf32>
    %72 = vector.shape_cast %71 : vector<4x8xf32> to vector<4x8x1xf32>
    %73 = tpu.reciprocal %72 {approx = true} : vector<4x8x1xf32> -> vector<4x8x1xf32>
    %74 = vector.broadcast %73 : vector<4x8x1xf32> to vector<4x8x8xf32>
    %75 = arith.mulf %70, %74 : vector<4x8x8xf32>
    "tpu.trace_start"() <{level = 10 : i32, message = "hnm,hmd->hnd"}> : () -> ()
    %cst_21 = arith.constant dense<0.000000e+00> : vector<4x8x8xf32>
    %76 = tpu.matmul %75, %62, %cst_21 {dimension_numbers = #tpu.dot_dimension_numbers<[2], [1], [1], [2], [0, 0, 0, 1, 1, 2], [0], [0]>} : vector<4x8x8xf32>, vector<4x8x8xf32>, vector<4x8x8xf32> -> vector<4x8x8xf32>
    "tpu.trace_stop"() : () -> ()
    %77 = vector.extract_strided_slice %76 {offsets = [0, 0, 0], sizes = [1, 8, 8], strides = [1, 1, 1]} : vector<4x8x8xf32> to vector<1x8x8xf32>
    %78 = vector.shape_cast %77 : vector<1x8x8xf32> to vector<8x8xf32>
    %c0_22 = arith.constant 0 : index
    %c0_23 = arith.constant 0 : index
    %79 = vector.load %arg15[%c0_22, %c0_23] : memref<8x32xf32, #tpu.memory_space<vmem>>, vector<8x8xf32>
    tpu.vector_store %arg15[%c0_22, %c0_23], %78 {strides = array<i32>} : memref<8x32xf32, #tpu.memory_space<vmem>>, vector<8x8xf32>,
    %80 = vector.extract_strided_slice %76 {offsets = [1, 0, 0], sizes = [1, 8, 8], strides = [1, 1, 1]} : vector<4x8x8xf32> to vector<1x8x8xf32>
    %81 = vector.shape_cast %80 : vector<1x8x8xf32> to vector<8x8xf32>
    %c0_24 = arith.constant 0 : index
    %c8 = arith.constant 8 : index
    %82 = vector.load %arg15[%c0_24, %c8] : memref<8x32xf32, #tpu.memory_space<vmem>>, vector<8x8xf32>
    tpu.vector_store %arg15[%c0_24, %c8], %81 {strides = array<i32>} : memref<8x32xf32, #tpu.memory_space<vmem>>, vector<8x8xf32>,
    %83 = vector.extract_strided_slice %76 {offsets = [2, 0, 0], sizes = [1, 8, 8], strides = [1, 1, 1]} : vector<4x8x8xf32> to vector<1x8x8xf32>
    %84 = vector.shape_cast %83 : vector<1x8x8xf32> to vector<8x8xf32>
    %c0_25 = arith.constant 0 : index
    %c16 = arith.constant 16 : index
    %85 = vector.load %arg15[%c0_25, %c16] : memref<8x32xf32, #tpu.memory_space<vmem>>, vector<8x8xf32>
    tpu.vector_store %arg15[%c0_25, %c16], %84 {strides = array<i32>} : memref<8x32xf32, #tpu.memory_space<vmem>>, vector<8x8xf32>,
    %86 = vector.extract_strided_slice %76 {offsets = [3, 0, 0], sizes = [1, 8, 8], strides = [1, 1, 1]} : vector<4x8x8xf32> to vector<1x8x8xf32>
    %87 = vector.shape_cast %86 : vector<1x8x8xf32> to vector<8x8xf32>
    %c0_26 = arith.constant 0 : index
    %c24 = arith.constant 24 : index
    %88 = vector.load %arg15[%c0_26, %c24] : memref<8x32xf32, #tpu.memory_space<vmem>>, vector<8x8xf32>
    tpu.vector_store %arg15[%c0_26, %c24], %87 {strides = array<i32>} : memref<8x32xf32, #tpu.memory_space<vmem>>, vector<8x8xf32>,
    %c0_27 = arith.constant 0 : index
    %c0_28 = arith.constant 0 : index
    %89 = vector.load %arg15[%c0_27, %c0_28] : memref<8x32xf32, #tpu.memory_space<vmem>>, vector<8x32xf32>
    %90 = arith.truncf %89 : vector<8x32xf32> to vector<8x32xbf16>
    %c0_29 = arith.constant 0 : index
    %c0_30 = arith.constant 0 : index
    %c0_31 = arith.constant 0 : index
    %91 = vector.load %arg6[%c0_29, %c0_30, %c0_31] : memref<1x32x32xbf16, #tpu.memory_space<vmem>>, vector<1x32x32xbf16>
    %92 = vector.shape_cast %91 : vector<1x32x32xbf16> to vector<32x32xbf16>
    %cst_32 = arith.constant dense<0.000000e+00> : vector<8x32xf32>
    %93 = tpu.matmul %90, %92, %cst_32 {dimension_numbers = #tpu.dot_dimension_numbers<[1], [0], [0], [1], [0, 0, 1, 1], [], []>} : vector<8x32xbf16>, vector<32x32xbf16>, vector<8x32xf32> -> vector<8x32xf32>
    %94 = arith.addf %4, %93 : vector<8x32xf32>
    %c0_33 = arith.constant 0 : index
    %c0_34 = arith.constant 0 : index
    %c0_35 = arith.constant 0 : index
    %95 = vector.load %arg7[%c0_33, %c0_34, %c0_35] : memref<1x1x32xf32, #tpu.memory_space<vmem>>, vector<1x1x32xf32>
    %96 = vector.shape_cast %95 : vector<1x1x32xf32> to vector<1x32xf32>
    %97 = vector.broadcast %96 : vector<1x32xf32> to vector<8x32xf32>
    %98 = arith.addf %94, %97 : vector<8x32xf32>
    %c0_36 = arith.constant 0 : index
    %c0_37 = arith.constant 0 : index
    %c0_38 = arith.constant 0 : index
    %99 = vector.load %arg8[%c0_36, %c0_37, %c0_38] : memref<1x1x32xf32, #tpu.memory_space<vmem>>, vector<1x1x32xf32>
    %100 = vector.shape_cast %99 : vector<1x1x32xf32> to vector<1x32xf32>
    %c0_39 = arith.constant 0 : index
    %c0_40 = arith.constant 0 : index
    %c0_41 = arith.constant 0 : index
    %101 = vector.load %arg9[%c0_39, %c0_40, %c0_41] : memref<1x1x32xf32, #tpu.memory_space<vmem>>, vector<1x1x32xf32>
    %102 = vector.shape_cast %101 : vector<1x1x32xf32> to vector<1x32xf32>
    %cst_42 = arith.constant dense<0.000000e+00> : vector<8xf32>
    %103 = vector.multi_reduction <add>, %98, %cst_42 [1] : vector<8x32xf32> to vector<8xf32>
    %104 = vector.shape_cast %103 : vector<8xf32> to vector<8x1xf32>
    %cst_43 = arith.constant 3.200000e+01 : f32
    %105 = vector.broadcast %cst_43 : f32 to vector<8x1xf32>
    %106 = arith.divf %104, %105 : vector<8x1xf32>
    %107 = vector.broadcast %106 : vector<8x1xf32> to vector<8x32xf32>
    %108 = arith.subf %98, %107 : vector<8x32xf32>
    %109 = arith.mulf %108, %108 : vector<8x32xf32>
    %cst_44 = arith.constant dense<0.000000e+00> : vector<8xf32>
    %110 = vector.multi_reduction <add>, %109, %cst_44 [1] : vector<8x32xf32> to vector<8xf32>
    %111 = vector.shape_cast %110 : vector<8xf32> to vector<8x1xf32>
    %cst_45 = arith.constant 3.200000e+01 : f32
    %112 = vector.broadcast %cst_45 : f32 to vector<8x1xf32>
    %113 = arith.divf %111, %112 : vector<8x1xf32>
    %cst_46 = arith.constant 9.99999974E-6 : f32
    %114 = vector.broadcast %cst_46 : f32 to vector<8x1xf32>
    %115 = arith.addf %113, %114 : vector<8x1xf32>
    %116 = math.rsqrt %115 : vector<8x1xf32>
    %117 = vector.broadcast %116 : vector<8x1xf32> to vector<8x32xf32>
    %118 = arith.mulf %108, %117 : vector<8x32xf32>
    %119 = vector.broadcast %100 : vector<1x32xf32> to vector<8x32xf32>
    %120 = arith.mulf %118, %119 : vector<8x32xf32>
    %121 = vector.broadcast %102 : vector<1x32xf32> to vector<8x32xf32>
    %122 = arith.addf %120, %121 : vector<8x32xf32>
    %123 = arith.truncf %122 : vector<8x32xf32> to vector<8x32xbf16>
    %c0_47 = arith.constant 0 : index
    %c0_48 = arith.constant 0 : index
    %c0_49 = arith.constant 0 : index
    %124 = vector.load %arg10[%c0_47, %c0_48, %c0_49] : memref<1x32x64xbf16, #tpu.memory_space<vmem>>, vector<1x32x64xbf16>
    %125 = vector.shape_cast %124 : vector<1x32x64xbf16> to vector<32x64xbf16>
    %cst_50 = arith.constant dense<0.000000e+00> : vector<8x64xf32>
    %126 = tpu.matmul %123, %125, %cst_50 {dimension_numbers = #tpu.dot_dimension_numbers<[1], [0], [0], [1], [0, 0, 1, 1], [], []>} : vector<8x32xbf16>, vector<32x64xbf16>, vector<8x64xf32> -> vector<8x64xf32>
    %c0_51 = arith.constant 0 : index
    %c0_52 = arith.constant 0 : index
    %c0_53 = arith.constant 0 : index
    %127 = vector.load %arg11[%c0_51, %c0_52, %c0_53] : memref<1x1x64xf32, #tpu.memory_space<vmem>>, vector<1x1x64xf32>
    %128 = vector.shape_cast %127 : vector<1x1x64xf32> to vector<1x64xf32>
    %129 = vector.broadcast %128 : vector<1x64xf32> to vector<8x64xf32>
    %130 = arith.addf %126, %129 : vector<8x64xf32>
    %cst_54 = arith.constant 5.000000e-01 : f32
    %131 = vector.broadcast %cst_54 : f32 to vector<8x64xf32>
    %132 = arith.mulf %131, %130 : vector<8x64xf32>
    %cst_55 = arith.constant 4.471500e-02 : f32
    %133 = vector.broadcast %cst_55 : f32 to vector<8x64xf32>
    %134 = arith.mulf %133, %130 : vector<8x64xf32>
    %135 = arith.mulf %134, %130 : vector<8x64xf32>
    %136 = arith.mulf %135, %130 : vector<8x64xf32>
    %137 = arith.addf %130, %136 : vector<8x64xf32>
    %cst_56 = arith.constant 0.797884583 : f32
    %138 = vector.broadcast %cst_56 : f32 to vector<8x64xf32>
    %139 = arith.mulf %138, %137 : vector<8x64xf32>
    %140 = math.tanh %139 : vector<8x64xf32>
    %cst_57 = arith.constant 1.000000e+00 : f32
    %141 = vector.broadcast %cst_57 : f32 to vector<8x64xf32>
    %142 = arith.addf %141, %140 : vector<8x64xf32>
    %143 = arith.mulf %132, %142 : vector<8x64xf32>
    %144 = arith.truncf %143 : vector<8x64xf32> to vector<8x64xbf16>
    %c0_58 = arith.constant 0 : index
    %c0_59 = arith.constant 0 : index
    %c0_60 = arith.constant 0 : index
    %145 = vector.load %arg12[%c0_58, %c0_59, %c0_60] : memref<1x64x32xbf16, #tpu.memory_space<vmem>>, vector<1x64x32xbf16>
    %146 = vector.shape_cast %145 : vector<1x64x32xbf16> to vector<64x32xbf16>
    %cst_61 = arith.constant dense<0.000000e+00> : vector<8x32xf32>
    %147 = tpu.matmul %144, %146, %cst_61 {dimension_numbers = #tpu.dot_dimension_numbers<[1], [0], [0], [1], [0, 0, 1, 1], [], []>} : vector<8x64xbf16>, vector<64x32xbf16>, vector<8x32xf32> -> vector<8x32xf32>
    %c0_62 = arith.constant 0 : index
    %c0_63 = arith.constant 0 : index
    %c0_64 = arith.constant 0 : index
    %148 = vector.load %arg13[%c0_62, %c0_63, %c0_64] : memref<1x1x32xf32, #tpu.memory_space<vmem>>, vector<1x1x32xf32>
    %149 = vector.shape_cast %148 : vector<1x1x32xf32> to vector<1x32xf32>
    %150 = vector.broadcast %149 : vector<1x32xf32> to vector<8x32xf32>
    %151 = arith.addf %147, %150 : vector<8x32xf32>
    %152 = arith.addf %98, %151 : vector<8x32xf32>
    %c0_65 = arith.constant 0 : index
    %c0_66 = arith.constant 0 : index
    %c0_67 = arith.constant 0 : index
    %153 = vector.load %arg14[%c0_65, %c0_66, %c0_67] : memref<1x8x32xf32, #tpu.memory_space<vmem>>, vector<1x8x32xf32>
    %154 = vector.shape_cast %153 : vector<1x8x32xf32> to vector<8x32xf32>
    %155 = vector.shape_cast %152 : vector<8x32xf32> to vector<1x8x32xf32>
    tpu.vector_store %arg14[%c0_65, %c0_66, %c0_67], %155 {strides = array<i32>} : memref<1x8x32xf32, #tpu.memory_space<vmem>>, vector<1x8x32xf32>,
    return
  }
  func.func @transform_0(%arg0: i32, %arg1: i32) -> (i32, i32, i32) {
    %c0_i32 = arith.constant 0 : i32
    %c0_i32_0 = arith.constant 0 : i32
    %c0_i32_1 = arith.constant 0 : i32
    return %arg0, %c0_i32, %c0_i32_0 : i32, i32, i32
  }
  func.func @transform_1(%arg0: i32, %arg1: i32) -> (i32, i32, i32) {
    %c0_i32 = arith.constant 0 : i32
    %c0_i32_0 = arith.constant 0 : i32
    %c0_i32_1 = arith.constant 0 : i32
    return %arg1, %c0_i32, %c0_i32_0 : i32, i32, i32
  }
  func.func @transform_2(%arg0: i32, %arg1: i32) -> (i32, i32, i32) {
    %c0_i32 = arith.constant 0 : i32
    %c0_i32_0 = arith.constant 0 : i32
    %c0_i32_1 = arith.constant 0 : i32
    return %arg1, %c0_i32, %c0_i32_0 : i32, i32, i32
  }
  func.func @transform_3(%arg0: i32, %arg1: i32) -> (i32, i32, i32) {
    %c0_i32 = arith.constant 0 : i32
    %c0_i32_0 = arith.constant 0 : i32
    %c0_i32_1 = arith.constant 0 : i32
    return %arg1, %c0_i32, %c0_i32_0 : i32, i32, i32
  }
  func.func @transform_4(%arg0: i32, %arg1: i32) -> (i32, i32, i32) {
    %c0_i32 = arith.constant 0 : i32
    %c0_i32_0 = arith.constant 0 : i32
    %c0_i32_1 = arith.constant 0 : i32
    return %arg1, %c0_i32, %c0_i32_0 : i32, i32, i32
  }
  func.func @transform_5(%arg0: i32, %arg1: i32) -> (i32, i32, i32) {
    %c0_i32 = arith.constant 0 : i32
    %c0_i32_0 = arith.constant 0 : i32
    %c0_i32_1 = arith.constant 0 : i32
    return %arg1, %c0_i32, %c0_i32_0 : i32, i32, i32
  }
  func.func @transform_6(%arg0: i32, %arg1: i32) -> (i32, i32, i32) {
    %c0_i32 = arith.constant 0 : i32
    %c0_i32_0 = arith.constant 0 : i32
    %c0_i32_1 = arith.constant 0 : i32
    return %arg1, %c0_i32, %c0_i32_0 : i32, i32, i32
  }
  func.func @transform_7(%arg0: i32, %arg1: i32) -> (i32, i32, i32) {
    %c0_i32 = arith.constant 0 : i32
    %c0_i32_0 = arith.constant 0 : i32
    %c0_i32_1 = arith.constant 0 : i32
    return %arg1, %c0_i32, %c0_i32_0 : i32, i32, i32
  }
  func.func @transform_8(%arg0: i32, %arg1: i32) -> (i32, i32, i32) {
    %c0_i32 = arith.constant 0 : i32
    %c0_i32_0 = arith.constant 0 : i32
    %c0_i32_1 = arith.constant 0 : i32
    return %arg1, %c0_i32, %c0_i32_0 : i32, i32, i32
  }
  func.func @transform_9(%arg0: i32, %arg1: i32) -> (i32, i32, i32) {
    %c0_i32 = arith.constant 0 : i32
    %c0_i32_0 = arith.constant 0 : i32
    %c0_i32_1 = arith.constant 0 : i32
    return %arg1, %c0_i32, %c0_i32_0 : i32, i32, i32
  }
  func.func @transform_10(%arg0: i32, %arg1: i32) -> (i32, i32, i32) {
    %c0_i32 = arith.constant 0 : i32
    %c0_i32_0 = arith.constant 0 : i32
    %c0_i32_1 = arith.constant 0 : i32
    return %arg1, %c0_i32, %c0_i32_0 : i32, i32, i32
  }
  func.func @transform_11(%arg0: i32, %arg1: i32) -> (i32, i32, i32) {
    %c0_i32 = arith.constant 0 : i32
    %c0_i32_0 = arith.constant 0 : i32
    %c0_i32_1 = arith.constant 0 : i32
    return %arg1, %c0_i32, %c0_i32_0 : i32, i32, i32
  }
  func.func @transform_12(%arg0: i32, %arg1: i32) -> (i32, i32, i32) {
    %c0_i32 = arith.constant 0 : i32
    %c0_i32_0 = arith.constant 0 : i32
    %c0_i32_1 = arith.constant 0 : i32
    return %arg0, %c0_i32, %c0_i32_0 : i32, i32, i32
  }
}

</mosaic_0001>

<bundles_post_ra>
// kernel: transformer_encoder.1
= control target key start
LH: loop header
LB: loop body
LE: loop exit
PB: predicated region body
PF: predicated region fallthrough
CT: control target
= control target key end

     0   :  { %s2623_s0 = inlined_call_operand.vmem [shape: f32[2,8,32], index: 0, kind: input, shape index: {}]   ;;  %s2624_s1 = inlined_call_operand.vmem [shape: f32[2,1,32], index: 1, kind: input, shape index: {}]   ;;  %s2625_s2 = inlined_call_operand.vmem [shape: f32[2,1,32], index: 2, kind: input, shape index: {}]   ;;  %s2626_s3 = inlined_call_operand.vmem [shape: bf16[2,32,96], index: 3, kind: input, shape index: {}]   ;;  %s2627_s4 = inlined_call_operand.vmem [shape: bf16[2,32,32], index: 4, kind: input, shape index: {}]   ;;  %s2628_s5 = inlined_call_operand.vmem [shape: f32[2,1,32], index: 5, kind: input, shape index: {}]   ;;  %s2629_s6 = inlined_call_operand.vmem [shape: f32[2,1,32], index: 6, kind: input, shape index: {}]   ;;  %s2630_s7 = inlined_call_operand.vmem [shape: f32[2,1,32], index: 7, kind: input, shape index: {}]   ;;  %s2631_s8 = inlined_call_operand.vmem [shape: bf16[2,32,64], index: 8, kind: input, shape index: {}]   ;;  %s2632_s9 = inlined_call_operand.vmem [shape: f32[2,1,64], index: 9, kind: input, shape index: {}]   ;;  %s2633_s10 = inlined_call_operand.vmem [shape: bf16[2,64,32], index: 10, kind: input, shape index: {}]   ;;  %s2634_s11 = inlined_call_operand.vmem [shape: f32[2,1,32], index: 11, kind: input, shape index: {}]   ;;  %s2635_s12 = inlined_call_operand.hbm [shape: f32[2,8,32], index: 12, kind: output, shape index: {}]  }
   0x1   :  { %2651 = sst [smem:[#allocation19_spill]] %s2623_s0 }
   0x2   :  { %2652 = sst [smem:[#allocation20_spill]] %s2626_s3 }
   0x3   :  { %2653 = sst [smem:[#allocation21_spill]] %s2627_s4 }
   0x4   :  { %2654 = sst [smem:[#allocation22_spill]] %s2635_s12 }
   0x5   :  { %17 = vsyncpa [#allocation4], 0 }
   0x6   :  { %19 = vsyncpa [#allocation4 + $0x1], 0  ;;  %s2286_s21 = smov 0   ;;  %s2288_s22 = smov 0  }
   0x7   :  { %s2290_s23 = smov 0   ;;  %s2292_s24 = smov 0  }
   0x8   :  { %s2294_s25 = smov 0   ;;  %s2296_s26 = smov 0  }
   0x9   :  { %s2298_s27 = smov 0   ;;  %s2300_s28 = smov 0  }
   0xa LB: > { %2655 = sst [smem:[#allocation6_spill]] %s2180_s21  ;;  %s1838_s29 = sadd.s32 4294967295, %s2208_s28   ;;  %s2208_s28 = sphi %s2300_s28, %s25_s28   ;;  %s2204_s27 = sphi %s2298_s27, %s2693_s27   ;;  %s2200_s26 = sphi %s2296_s26, %s2692_s26   ;;  %s2196_s25 = sphi %s2294_s25, %s2691_s25   ;;  %s2192_s24 = sphi %s2292_s24, %s2690_s24   ;;  %s2188_s23 = sphi %s2290_s23, %s2689_s23   ;;  %s2184_s22 = sphi %s2288_s22, %s2688_s22   ;;  %s2180_s21 = sphi %s2286_s21, %s2687_s21  }
   0xb   : > { %2656 = sst [smem:[#allocation7_spill]] %s2184_s22  ;;  %s1839_s30 = sadd.s32 4294967294, %s2208_s28  }
   0xc   : > { %2657 = sst [smem:[#allocation8_spill]] %s2188_s23  ;;  %s34_s13 = sadd.s32 1, %s2200_s26 }
   0xd   : > { %2658 = sst [smem:[#allocation9_spill]] %s2192_s24  ;;  %p35_p0 = scmp.ge.s32.totalorder %s34_s13, 2 }
   0xe   : > { %2659 = sst [smem:[#allocation10_spill]] %s2196_s25  ;;  %s37_s14 = sadd.s32 1, %s2204_s27 }
   0xf   : > { %2660 = sst [smem:[#allocation11_spill]] %s2200_s26  ;;  %p366_p1 = scmp.ne.s32.totalorder %s2188_s23, %s2184_s22 }
  0x10   : > { %2661 = sst [smem:[#allocation12_spill]] %s2204_s27  ;;  %p367_p2 = scmp.eq.s32.totalorder %s1838_s29, 3 }
  0x11   : > { %2662 = sst [smem:[#allocation13_spill]] %s2208_s28  ;;  %s2695_s13 = smov (%p35_p0, %s34_s13), 0 }
  0x12   : > { %2663 = sst [smem:[#allocation14_spill]] %s2695_s13  ;;  %s2697_s14 = smov (!%p35_p0, %s37_s14), %s2204_s27 }
  0x13   : > { %p2335_p3 = por %p367_p2, %p366_p1  ;;  %p372_p4 = scmp.ne.s32.totalorder %s2184_s22, %s2180_s21 }
  0x14   : > { %p39_p5 = scmp.ge.s32.totalorder %s2697_s14, 2  ;;  %p373_p6 = scmp.eq.s32.totalorder %s1839_s30, 3 }
  0x15   : > { %s2664_s15 = scalar_select %p2335_p3, 1, 0 }
  0x16   : > { %p1842_p7 = scmp.ge.s32.totalorder %s2208_s28, 1  ;;  %p472_p8 = scmp.lt.s32.totalorder %s2208_s28, 5 }
  0x17   : > { %2665 = sst [smem:[#allocation15_spill]] %s2664_s15  ;;  %s2699_s14 = smov (%p39_p5, %s2697_s14), 0 }
  0x18   : > { %2666 = sst [smem:[#allocation16_spill]] %s2699_s14  ;;  %p2345_p9 = por %p373_p6, %p372_p4 }
  0x19   : > { %p473_p10 = pnand %p1842_p7, %p472_p8  ;;  %s353_s17 = ssub.s32 %s2204_s27, %s2699_s14 }
  0x1a   : > { %s2667_s16 = scalar_select %p2345_p9, 1, 0 }
  0x1b   : > { %s356_s18 = sadd.s32 1, %s2188_s23  ;;  %p354_p11 = scmp.eq.s32.totalorder %s353_s17, 0 }
  0x1c   : > { %2668 = sst [smem:[#allocation17_spill]] %s2667_s16  ;;  %476 = sbr.rel (%p473_p10) target bundleno = 2688 (0xa80), region = 68 }
  0x1d   : > { %s2353_s19 = scalar_select %p354_p11, %s2188_s23, %s356_s18  }
  0x1e   : > { %s2639_s20 = sand.u32 (!%p473_p10), 1, %s2184_s22   ;;  %p554_p12 = scmp.lt.s32.totalorder (!%p473_p10), %s2196_s25, 1 }
  0x1f   : > { %2669 = sst [smem:[#allocation18_spill]] %s2353_s19  ;;  %s1843_s29 = sshll.u32 (!%p473_p10), %s2639_s20, 3 }
  0x20   : > { %p558_p13 = scmp.lt.s32.totalorder (!%p473_p10), %s2192_s24, 1  ;;  %s2670_s0 = sld [smem:[#allocation19_spill]] (!%p473_p10) }
  0x21   : > { %s2671_s3 = sld [smem:[#allocation20_spill]] (!%p473_p10)  ;;  %s2672_s4 = sld [smem:[#allocation21_spill]] (!%p473_p10) }
  0x22   : > { %s2417_s16 = scalar_lea.vmem (!%p473_p10), [#allocation3], %s1843_s29  ;;  %s2673_s19 = sld [smem:[#allocation9_spill]] (!%p473_p10) }
  0x23   : > { %s555_s30 = scalar_select %p554_p12, %s2196_s25, 1 }
  0x24   : > { %s2362_s13 = scalar_select %p558_p13, %s2192_s24, 1 }
  0x25   : > { %s1844_s17 = sshll.u32 %s555_s30, 3 }
  0x26   : > { %s557_s27 = scalar_lea.vmem %s2670_s0, %s1844_s17  ;;  %s1891_s28 = sshll.u32 %s2362_s13, 4 }
  0x27   : > { %s2379_s22 = scalar_lea.vmem %s2671_s3, %s1891_s28  ;;  %s2384_s24 = scalar_lea.vmem %s2672_s4, %s1891_s28 }
  0x28   : > { %s579_s23 = scalar_lea.vmem %s2629_s6, %s2362_s13  ;;  %s2401_s0 = scalar_lea.vmem %s2631_s8, %s1891_s28 }
  0x29   : > { %s590_s3 = scalar_lea.vmem %s2632_s9, %s2362_s13  ;;  %s1894_s4 = sshll.u32 %s2362_s13, 5 }
  0x2a   : > { %s2411_s26 = scalar_lea.vmem %s2633_s10, %s1894_s4  ;;  %s598_s21 = scalar_lea.vmem %s2634_s11, %s2362_s13 }
  0x2b   : > { %p1853_p0 = scmp.ne.s32.totalorder %s2673_s19, 0 }
  0x2c   : > { %v604_v0 = vld [vmem:[%s557_s27] sm:$0xff] (!%p1853_p0)  ;;  %vm605_vm0 = vcmask (!%p1853_p0), 261120  }
  0x2d   : > { %603 = sbr.rel (%p1853_p0) target bundleno = 52 (0x34), region = 72  ;;  %606 = vst.msk [vmem:[%s2417_s16] sm:$0xff] (!%p1853_p0), %vm605_vm0, %v604_v0 }
  0x34 PF: > { %v2422_v1 = vld [vmem:[%s2417_s16] sm:$0xff]  ;;  %vm610_vm1 = vcmask 261120   ;;  %v2082_v8 = vld [vmem:[%s2379_s22] sm:$0xff]   ;;  %v2210_v9 = vmov 0.0   ;;  %vm2211_vm2 = vmmov 0   ;;  %s2674_s28 = scalar_lea.vmem %s2624_s1, %s2362_s13  ;;  %s2675_s29 = scalar_lea.vmem %s2625_s2, %s2362_s13  ;;  %vm708_vm3 = vcmask 64512  }
  0x35   : > { %v611_v2 = vsel %vm610_vm1, %v2422_v1, 0.0  ;;  %1925 = vmatprep.subr.bf16.mxu0 %v2210_v9  ;;  %1929 = vmatprep.mubr.msk.bf16.mxu0 %vm2211_vm2, %v2210_v9  ;;  %v2083_v10 = vld [vmem:[%s2379_s22 + $0x8] sm:$0xff]   ;;  %v1854_v15 = vld [vmem:[%s2674_s28] ss:$0 sm:$0xff]  ;;  %s2212_s12 = smov 104   ;;  %s2213_s15 = smov 120  }
  0x36   : > { %612 = vadd.xlane.f32.xlu0 %v611_v2  ;;  %1926 = vmatpush3.bf16.msra.mxu0 %v2082_v8  ;;  %v1855_v17 = vld [vmem:[%s2675_s29] ss:$0 sm:$0xff]  ;;  %s2214_s25 = smov 112   ;;  %s2215_s30 = smov 96   ;;  %vm1368_vm4 = vcmask 130112   ;;  %vm1374_vm5 = vcmask 195712  }
  0x37   : > { %1938 = vmatprep.subr.mxu1 %v2210_v9  ;;  %1927 = vmatprep.subr.bf16.mxu0 %v2210_v9  ;;  %s2216_s14 = smov 64   ;;  %s2217_s17 = smov 8   ;;  %vm1380_vm6 = vcmask 261312   ;;  %vm1597_vm7 = vcmask 523264  }
  0x38   : > { %1940 = vmatprep.mubr.msk.f32.mxu1 %vm2211_vm2, %v2210_v9  ;;  %s2218_s20 = smov 16   ;;  %s2219_s18 = smov 24  }
  0x39   : > { %s2676_s27 = scalar_lea.vmem %s2628_s5, %s2362_s13  ;;  %s2220_s22 = smov [#allocation3]  }
  0x3a   : > { %1928 = vmatpush3.bf16.msra.mxu0 %v2083_v10  ;;  %s2118_s19 = sshll.u32 %s2220_s22, 4  ;;  %s2119_s19 = int_to_ptr.vmem [resolvable:$false] %s2118_s19 }
  0x3b   : > { %1933 = vmatprep.subr.mxu0 %v2210_v9  ;;  %s2120_s29 = scalar_lea.vmem %s2119_s19, 256 }
  0xc3   : > { %v613_v3 = vpop.xlane.xlu0 %612 }
  0xc4   : > { %v615_v4 = vmul.f32 0.03125, %v613_v3 }
  0xc6   : > { %v616_v5 = vsub.f32 %v2422_v1, %v615_v4 }
  0xc8   : > { %v617_v6 = vmul.f32 %v616_v5, %v616_v5 }
  0xca   : > { %v618_v7 = vsel %vm610_vm1, %v617_v6, 0.0 }
  0xcb   : > { %619 = vadd.xlane.f32.xlu0 %v618_v7 }
 0x158   : > { %v620_v11 = vpop.xlane.xlu0 %619 }
 0x159   : > { %v621_v12 = vmul.f32 0.03125, %v620_v11 }
 0x15b   : > { %v622_v13 = vadd.f32 1e-05, %v621_v12 }
 0x15d   : > { %2092 = vrsqrt.f32 %v622_v13 }
 0x167   : > { %v2093_v14 = vpop.eup %2092 }
 0x168   : > { %v624_v16 = vmul.f32 %v2093_v14, %v616_v5 }
 0x16a   : > { %v631_v18 = vmul.f32 %v1854_v15, %v624_v16 }
 0x16c   : > { %v638_v19 = vadd.f32 %v1855_v17, %v631_v18 }
 0x16e   : > { %v639_v20 = vpack.c.bf16 %v638_v19, %v638_v19 }
 0x170   : > { %1930 = vmatmul.mubr.msk.bf16.vlgmr.msra.gmra.mrb[0].mxu0 %vm610_vm1, %v639_v20 }
 0x171   : > { %1935 = vmatprep.mubr.msk.f32.mxu0 %vm2211_vm2, %v2210_v9 }
 0x243   : > { %v693_v21 = vpop.f32.mrb[0].mxu0 }
 0x244   : > { %704 = vrot.lane.b32.xlu0 %v693_v21, %s2212_s12  ;;  %700 = vrot.lane.b32.xlu1 %v693_v21, %s2213_s15  ;;  %v1931_v22 = vpop.f32.mrb[1].mxu0  ;;  %s2678_s15 = sld [smem:[#allocation10_spill]] }
 0x245   : > { %v696_v23 = vpop.f32.mrb[2].mxu0 }
 0x246   : > { %v1932_v24 = vpop.f32.mrb[3].mxu0 }
 0x247   : > { %v2084_v24 = vld [vmem:[%s2384_s24] sm:$0xff]  }
 0x248   : > { %702 = vrot.lane.b32.xlu1 %v693_v21, %s2214_s25 }
 0x24c   : > { %706 = vrot.lane.b32.xlu1 %v693_v21, %s2215_s30 }
 0x2b6   : > { %v2451_v25 = vpop.permute.xlu1 %700  ;;  %v2454_v27 = vpop.permute.xlu0 %704 }
 0x2b7   : > { %783 = vrot.lane.b32.xlu1 %v2451_v25, %s2215_s30 }
 0x2ba   : > { %v703_v26 = vpop.permute.xlu1 %702 }
 0x2bb   : > { %859 = vrot.lane.b32.xlu1 %v703_v26, %s2215_s30 }
 0x2be   : > { %v707_v28 = vpop.permute.xlu1 %706 }
 0x2bf   : > { %935 = vrot.lane.b32.xlu1 %v2454_v27, %s2215_s30  ;;  %1934 = vmatpush3.xpose.msk.msra.mxu0 %vm708_vm3, %v707_v28 }
 0x2c0   : > { %1948 = vmatprep.subr.mxu0 %v2210_v9 }
 0x2c2   : > { %1936 = vmatmul.mubr.msk.f32.vlgmr.msra.gmra.mrb[4].mxu0 %vm708_vm3, %v693_v21 }
 0x2c3   : > { %1950 = vmatprep.mubr.msk.f32.mxu0 %vm2211_vm2, %v2210_v9 }
 0x329   : > { %v784_v29 = vpop.permute.xlu1 %783 }
 0x32a   : > { %1939 = vmatpush3.xpose.msk.msra.mxu1 %vm708_vm3, %v784_v29 }
 0x32b   : > { %1943 = vmatprep.subr.mxu1 %v2210_v9 }
 0x32d   : > { %1941 = vmatmul.mubr.msk.f32.vlgmr.msra.gmra.mrb[0].mxu1 %vm708_vm3, %v2451_v25  ;;  %v860_v30 = vpop.permute.xlu1 %859 }
 0x32e   : > { %1944 = vmatpush3.xpose.msk.msra.mxu1 %vm708_vm3, %v860_v30  ;;  %1945 = vmatprep.mubr.msk.f32.mxu1 %vm2211_vm2, %v2210_v9 }
 0x32f   : > { %1953 = vmatprep.subr.mxu1 %v2210_v9 }
 0x331   : > { %1946 = vmatmul.mubr.msk.f32.vlgmr.msra.gmra.mrb[2].mxu1 %vm708_vm3, %v703_v26  ;;  %v936_v31 = vpop.permute.xlu1 %935 }
 0x332   : > { %1949 = vmatpush3.xpose.msk.msra.mxu0 %vm708_vm3, %v936_v31  ;;  %1955 = vmatprep.mubr.msk.f32.mxu1 %vm2211_vm2, %v2210_v9 }
 0x333   : > { %1958 = vmatprep.subr.mxu0 %v2210_v9 }
 0x335   : > { %1951 = vmatmul.mubr.msk.f32.vlgmr.msra.gmra.mrb[6].mxu0 %vm708_vm3, %v2454_v27 }
 0x336   : > { %1960 = vmatprep.mubr.msk.f32.mxu0 %vm2211_vm2, %v2210_v9 }
 0x395   : > { %v779_v32 = vpop.f32.mrb[4].mxu0 }
 0x396   : > { %v1011_v33 = vmul.f32 0.35355338, %v779_v32  ;;  %v1937_v34 = vpop.f32.mrb[5].mxu0 }
 0x398   : > { %v1015_v35 = vsel %vm708_vm3, %v1011_v33, -inf }
 0x399   : > { %1016 = vmax.xlane.f32.xlu1 %v1015_v35 }
 0x400   : > { %v855_v36 = vpop.f32.mrb[0].mxu1 }
 0x401   : > { %v1012_v37 = vmul.f32 0.35355338, %v855_v36  ;;  %v1942_v38 = vpop.f32.mrb[1].mxu1 }
 0x402   : > { %v1874_v38 = vld [vmem:[%s2676_s27] ss:$0 sm:$0xff] }
 0x403   : > { %v1018_v39 = vsel %vm708_vm3, %v1012_v37, -inf }
 0x404   : > { %1019 = vmax.xlane.f32.xlu0 %v1018_v39  ;;  %v931_v40 = vpop.f32.mrb[2].mxu1 }
 0x405   : > { %v1013_v41 = vmul.f32 0.35355338, %v931_v40  ;;  %v1947_v42 = vpop.f32.mrb[3].mxu1 }
 0x407   : > { %v1021_v43 = vsel %vm708_vm3, %v1013_v41, -inf }
 0x408   : > { %1022 = vmax.xlane.f32.xlu1 %v1021_v43  ;;  %v1007_v44 = vpop.f32.mrb[6].mxu0 }
 0x409   : > { %v1014_v45 = vmul.f32 0.35355338, %v1007_v44  ;;  %v1952_v46 = vpop.f32.mrb[7].mxu0 }
 0x40b   : > { %v1024_v47 = vsel %vm708_vm3, %v1014_v45, -inf }
 0x40c   : > { %1025 = vmax.xlane.f32.xlu0 %v1024_v47 }
 0x419   : > { %1059 = vrot.lane.b32.xlu1 %v693_v21, %s2216_s14 }
 0x426   : > { %v1017_v48 = vpop.xlane.xlu1 %1016 }
 0x427   : > { %v1027_v49 = vsub.f32 %v1011_v33, %v1017_v48 }
 0x429   : > { %v1031_v50 = vmul.f32 1.442695, %v1027_v49 }
 0x42b   : > { %2094 = vpow2.f32 %v1031_v50  ;;  %v2087_v50 = vld [vmem:[%s2401_s0 + $0x8] sm:$0xff]  }
 0x435   : > { %v2095_v51 = vpop.eup %2094 }
 0x436   : > { %v1039_v52 = vsel %vm708_vm3, %v2095_v51, 0.0 }
 0x43d   : > { %1040 = vadd.xlane.f32.xlu1 %v1039_v52 }
 0x44e   : > { %1211 = vrot.lane.b32.xlu1 %v703_v26, %s2216_s14 }
 0x491   : > { %v1020_v53 = vpop.xlane.xlu0 %1019 }
 0x492   : > { %v1028_v54 = vsub.f32 %v1012_v37, %v1020_v53 }
 0x494   : > { %v1033_v55 = vmul.f32 1.442695, %v1028_v54 }
 0x495   : > { %v1023_v56 = vpop.xlane.xlu1 %1022 }
 0x496   : > { %2096 = vpow2.f32 %v1033_v55  ;;  %v1029_v57 = vsub.f32 %v1013_v41, %v1023_v56  ;;  %v1875_v55 = vld [vmem:[%s579_s23] ss:$0 sm:$0xff] }
 0x498   : > { %v1035_v58 = vmul.f32 1.442695, %v1029_v57 }
 0x499   : > { %v1060_v59 = vpop.permute.xlu1 %1059  ;;  %v1026_v60 = vpop.xlane.xlu0 %1025 }
 0x49a   : > { %2098 = vpow2.f32 %v1035_v58  ;;  %v1030_v61 = vsub.f32 %v1014_v45, %v1026_v60  ;;  %1954 = vmatpush3.msra.mxu1 %v1060_v59 }
 0x49b   : > { %1963 = vmatprep.subr.mxu1 %v2210_v9 }
 0x49c   : > { %v1037_v62 = vmul.f32 1.442695, %v1030_v61  ;;  %v2088_v61 = vld [vmem:[%s2411_s26] sm:$0xff]  }
 0x49e   : > { %2100 = vpow2.f32 %v1037_v62  ;;  %v2089_v62 = vld [vmem:[%s2411_s26 + $0x8] sm:$0xff]  }
 0x4a0   : > { %v2097_v63 = vpop.eup %2096 }
 0x4a1   : > { %v1042_v0 = vsel %vm708_vm3, %v2097_v63, 0.0 }
 0x4a2   : > { %1043 = vadd.xlane.f32.xlu0 %v1042_v0  ;;  %v2091_v0 = vld [vmem:[%s2411_s26 + $0x18] sm:$0xff]  }
 0x4a4   : > { %v2099_v2 = vpop.eup %2098 }
 0x4a5   : > { %v1045_v3 = vsel %vm708_vm3, %v2099_v2, 0.0 }
 0x4a6   : > { %1046 = vadd.xlane.f32.xlu1 %v1045_v3 }
 0x4a8   : > { %v2101_v4 = vpop.eup %2100 }
 0x4a9   : > { %v1048_v5 = vsel %vm708_vm3, %v2101_v4, 0.0 }
 0x4aa   : > { %1049 = vadd.xlane.f32.xlu0 %v1048_v5 }
 0x4b7   : > { %1287 = vrot.lane.b32.xlu1 %v2454_v27, %s2216_s14 }
 0x4c0   : > { %1135 = vrot.lane.b32.xlu0 %v2451_v25, %s2216_s14  ;;  %v2085_v25 = vld [vmem:[%s2384_s24 + $0x8] sm:$0xff]   ;;  %s1888_s14 = sshll.u32 %s2678_s15, 7  ;;  %s2681_s24 = sld [smem:[#allocation22_spill]] }
 0x4c6   : > { %s2682_s4 = smov %s2681_s24  ;;  %s2566_s27 = scalar_lea.hbm %s2681_s24, %s1888_s14 }
 0x4ca   : > { %v1041_v6 = vpop.xlane.xlu1 %1040 }
 0x4cb   : > { %2102 = vrcp.f32 %v1041_v6 }
 0x4ce   : > { %v1212_v10 = vpop.permute.xlu1 %1211 }
 0x4d5   : > { %v2103_v7 = vpop.eup %2102 }
 0x4d6   : > { %v1055_v8 = vmul.f32 %v2103_v7, %v2095_v51 }
 0x4d8   : > { %1956 = vmatmul.mubr.msk.f32.vlgmr.msra.gmra.mrb[4].mxu1 %vm708_vm3, %v1055_v8 }
 0x4d9   : > { %1964 = vmatpush3.msra.mxu1 %v1212_v10  ;;  %1965 = vmatprep.mubr.msk.f32.mxu1 %vm2211_vm2, %v2210_v9 }
 0x4da   : > { %1973 = vmatprep.subr.bf16.mxu1 %v2210_v9 }
 0x52f   : > { %v1044_v11 = vpop.xlane.xlu0 %1043 }
 0x530   : > { %2104 = vrcp.f32 %v1044_v11 }
 0x533   : > { %v1047_v12 = vpop.xlane.xlu1 %1046 }
 0x534   : > { %2106 = vrcp.f32 %v1047_v12 }
 0x537   : > { %v1050_v13 = vpop.xlane.xlu0 %1049  ;;  %v1288_v17 = vpop.permute.xlu1 %1287 }
 0x538   : > { %2108 = vrcp.f32 %v1050_v13 }
 0x53a   : > { %v2105_v14 = vpop.eup %2104 }
 0x53b   : > { %v1056_v15 = vmul.f32 %v2105_v14, %v2097_v63  ;;  %v1136_v16 = vpop.permute.xlu0 %1135  ;;  %v2090_v63 = vld [vmem:[%s2411_s26 + $0x10] sm:$0xff]  }
 0x53c   : > { %1959 = vmatpush3.msra.mxu0 %v1136_v16 }
 0x53d   : > { %1961 = vmatmul.mubr.msk.f32.vlgmr.msra.gmra.mrb[8].mxu0 %vm708_vm3, %v1056_v15  ;;  %1968 = vmatprep.subr.mxu0 %v2210_v9 }
 0x53e   : > { %v2107_v18 = vpop.eup %2106  ;;  %1969 = vmatpush3.msra.mxu0 %v1288_v17  ;;  %1970 = vmatprep.mubr.msk.f32.mxu0 %vm2211_vm2, %v2210_v9 }
 0x53f   : > { %v1057_v19 = vmul.f32 %v2107_v18, %v2099_v2  ;;  %1981 = vmatprep.subr.bf16.mxu0 %v2210_v9  ;;  %v1877_v2 = vld [vmem:[%s590_s3] ss:$0 sm:$0xff]  ;;  %s2679_s3 = sld [smem:[#allocation7_spill]] }
 0x540   : > { %v1881_v18 = vld [vmem:[%s598_s21] ss:$0 sm:$0xff] }
 0x541   : > { %1966 = vmatmul.mubr.msk.f32.vlgmr.msra.gmra.mrb[6].mxu1 %vm708_vm3, %v1057_v19 }
 0x542   : > { %v2109_v20 = vpop.eup %2108  ;;  %1977 = vmatprep.mubr.msk.bf16.mxu1 %vm2211_vm2, %v2210_v9  ;;  %1974 = vmatpush3.bf16.msra.mxu1 %v2084_v24 }
 0x543   : > { %v1058_v21 = vmul.f32 %v2109_v20, %v2101_v4  ;;  %1975 = vmatprep.subr.bf16.mxu1 %v2210_v9 }
 0x545   : > { %1971 = vmatmul.mubr.msk.f32.vlgmr.msra.gmra.mrb[10].mxu0 %vm708_vm3, %v1058_v21 }
 0x546   : > { %1985 = vmatprep.mubr.msk.bf16.mxu0 %vm2211_vm2, %v2210_v9  ;;  %1976 = vmatpush3.bf16.msra.mxu1 %v2085_v25 }
 0x547   : > { %1989 = vmatprep.subr.bf16.mxu1 %v2210_v9 }
 0x5ab   : > { %v1131_v22 = vpop.f32.mrb[4].mxu1 }
 0x5ac   : > { %1363 = vst.msk [vmem:[#allocation2] sm:$0xff] %vm708_vm3, %v1131_v22  ;;  %v1957_v23 = vpop.f32.mrb[5].mxu1 }
 0x610   : > { %v1207_v26 = vpop.f32.mrb[8].mxu0 }
 0x611   : > { %1365 = vrot.lane.b32.xlu0 %v1207_v26, %s2217_s17  ;;  %v1962_v27 = vpop.f32.mrb[9].mxu0  ;;  %s1657_s17 = sshll.u32 %s2417_s16, 4  ;;  %s2568_s17 = int_to_ptr.vmem [resolvable:$true] %s1657_s17 }
 0x612   : > { %s2114_s28 = scalar_lea.vmem %s2568_s17, 128  ;;  %p2121_p5 = scmp.lt.s32.totalorder %s2568_s17, %s2119_s19 }
 0x613   : > { %p2115_p1 = scmp.ne.s32.totalorder %s2568_s17, %s2114_s28  ;;  %p2122_p6 = scmp.lt.s32.totalorder %s2120_s29, %s2114_s28 }
 0x614   : > { %v1283_v28 = vpop.f32.mrb[6].mxu1 }
 0x615   : > { %1371 = vrot.lane.b32.xlu1 %v1283_v28, %s2218_s20  ;;  %v1967_v29 = vpop.f32.mrb[7].mxu1  ;;  %p2116_p2 = pnand %p2115_p1, %p2335_p3  ;;  %p2123_p7 = por %p2122_p6, %p2121_p5 }
 0x617   : > { %p2117_p4 = pneg %p2116_p2 }
 0x618   : > { %v1359_v30 = vpop.f32.mrb[10].mxu0 }
 0x619   : > { %1377 = vrot.lane.b32.xlu0 %v1359_v30, %s2219_s18  ;;  %v1972_v31 = vpop.f32.mrb[11].mxu0  ;;  %p2124_p8 = pnand %p2123_p7, %p2117_p4 }
 0x683   : > { %v1366_v32 = vpop.permute.xlu0 %1365 }
 0x684   : > { %1369 = vst.msk [vmem:[#allocation2] sm:$0xff] %vm1368_vm4, %v1366_v32 }
 0x687   : > { %v1372_v33 = vpop.permute.xlu1 %1371 }
 0x688   : > { %1375 = vst.msk [vmem:[#allocation2] sm:$0xff] %vm1374_vm5, %v1372_v33 }
 0x68b   : > { %v1378_v34 = vpop.permute.xlu0 %1377 }
 0x68c   : > { %1381 = vst.msk [vmem:[#allocation2] sm:$0xff] %vm1380_vm6, %v1378_v34 }
 0x693   : > { %v1382_v35 = vld [vmem:[#allocation2] sm:$0xff] }
 0x694   : > { %v1383_v36 = vpack.c.bf16 %v1382_v35, %v1382_v35 }
 0x696   : > { %1978 = vmatmul.mubr.msk.bf16.vlgmr.msra.gmra.mrb[8].mxu1 %vm610_vm1, %v1383_v36 }
 0x697   : > { %1997 = vmatprep.mubr.msk.bf16.mxu1 %vm2211_vm2, %v2210_v9  ;;  %1990 = vmatpush3.bf16.msra.mxu1 %v2088_v61 }
 0x698   : > { %1991 = vmatprep.subr.bf16.mxu1 %v2210_v9 }
 0x69b   : > { %1992 = vmatpush3.bf16.msra.mxu1 %v2089_v62 }
 0x69c   : > { %1993 = vmatprep.subr.bf16.mxu1 %v2210_v9 }
 0x69f   : > { %1994 = vmatpush3.bf16.msra.mxu1 %v2090_v63 }
 0x6a0   : > { %1995 = vmatprep.subr.bf16.mxu1 %v2210_v9 }
 0x6a3   : > { %1996 = vmatpush3.bf16.msra.mxu1 %v2091_v0 }
 0x769   : > { %v1437_v37 = vpop.f32.mrb[8].mxu1 }
 0x76a   : > { %v1443_v39 = vadd.f32 %v1437_v37, %v2422_v1  ;;  %v1979_v40 = vpop.f32.mrb[9].mxu1  ;;  %v2086_v1 = vld [vmem:[%s2401_s0] sm:$0xff]   ;;  %s2677_s0 = scalar_lea.vmem %s2630_s7, %s2362_s13  ;;  %s2683_s13 = sand.u32 1, %s2679_s3  }
 0x76b   : > { %v1440_v41 = vpop.f32.mrb[10].mxu1  ;;  %1982 = vmatpush3.bf16.msra.mxu0 %v2086_v1  ;;  %v1876_v57 = vld [vmem:[%s2677_s0] ss:$0 sm:$0xff]  ;;  %s1644_s21 = scalar_lea.sflag [#allocation4], %s2683_s13 }
 0x76c   : > { %v2523_v42 = vadd.f32 %v1874_v38, %v1443_v39  ;;  %v1980_v43 = vpop.f32.mrb[11].mxu1  ;;  %1983 = vmatprep.subr.bf16.mxu0 %v2210_v9 }
 0x76e   : > { %v1454_v44 = vsel %vm610_vm1, %v2523_v42, 0.0 }
 0x76f   : > { %1455 = vadd.xlane.f32.xlu1 %v1454_v44  ;;  %1984 = vmatpush3.bf16.msra.mxu0 %v2087_v50 }
 0x7fc   : > { %v1456_v45 = vpop.xlane.xlu1 %1455 }
 0x7fd   : > { %v1457_v46 = vmul.f32 0.03125, %v1456_v45 }
 0x7ff   : > { %v1458_v47 = vsub.f32 %v2523_v42, %v1457_v46 }
 0x801   : > { %v1459_v48 = vmul.f32 %v1458_v47, %v1458_v47 }
 0x803   : > { %v1460_v49 = vsel %vm610_vm1, %v1459_v48, 0.0 }
 0x804   : > { %1461 = vadd.xlane.f32.xlu0 %v1460_v49 }
 0x891   : > { %v1462_v51 = vpop.xlane.xlu0 %1461 }
 0x892   : > { %v1463_v52 = vmul.f32 0.03125, %v1462_v51 }
 0x894   : > { %v1464_v53 = vadd.f32 1e-05, %v1463_v52 }
 0x896   : > { %2110 = vrsqrt.f32 %v1464_v53 }
 0x8a0   : > { %v2111_v54 = vpop.eup %2110 }
 0x8a1   : > { %v1466_v56 = vmul.f32 %v2111_v54, %v1458_v47 }
 0x8a3   : > { %v1473_v58 = vmul.f32 %v1875_v55, %v1466_v56 }
 0x8a5   : > { %v1480_v59 = vadd.f32 %v1876_v57, %v1473_v58 }
 0x8a7   : > { %v1481_v60 = vpack.c.bf16 %v1480_v59, %v1480_v59 }
 0x8a9   : > { %1986 = vmatmul.mubr.msk.bf16.vlgmr.msra.gmra.mrb[12].mxu0 %vm610_vm1, %v1481_v60 }
 0x97c   : > { %v1542_v3 = vpop.f32.mrb[12].mxu0 }
 0x97d   : > { %v1543_v4 = vadd.f32 %v1877_v2, %v1542_v3  ;;  %v1987_v5 = vpop.f32.mrb[13].mxu0 }
 0x97e   : > { %v1545_v6 = vpop.f32.mrb[14].mxu0 }
 0x97f   : > { %v1549_v7 = vmul.f32 0.044715, %v1543_v4  ;;  %v1988_v8 = vpop.f32.mrb[15].mxu0  ;;  %v1548_v14 = vmul.f32 0.5, %v1543_v4 }
 0x981   : > { %v1550_v10 = vmul.f32 %v1549_v7, %v1543_v4 }
 0x983   : > { %v1551_v11 = vmul.f32 %v1550_v10, %v1543_v4 }
 0x985   : > { %v1552_v12 = vadd.f32 %v1551_v11, %v1543_v4 }
 0x987   : > { %v1553_v13 = vmul.f32 0.7978846, %v1552_v12 }
 0x989   : > { %2112 = vtanh.f32 %v1553_v13 }
 0x993   : > { %v2113_v9 = vpop.eup %2112 }
 0x994   : > { %v1555_v15 = vadd.f32 1.0, %v2113_v9 }
 0x996   : > { %v1556_v16 = vmul.f32 %v1555_v15, %v1548_v14 }
 0x998   : > { %v1557_v17 = vpack.c.bf16 %v1556_v16, %v1556_v16 }
 0x99a   : > { %1998 = vmatmul.mubr.msk.bf16.vlgmr.msra.gmra.mrb[12].mxu1 %vm1597_vm7, %v1557_v17 }
 0xa6d   : > { %v1635_v19 = vpop.f32.mrb[12].mxu1 }
 0xa6e   : > { %v1636_v20 = vadd.f32 %v1881_v18, %v1635_v19  ;;  %v1999_v21 = vpop.f32.mrb[13].mxu1 }
 0xa6f   : > { %v1638_v22 = vpop.f32.mrb[14].mxu1 }
 0xa70   : > { %v1641_v23 = vadd.f32 %v1636_v20, %v2523_v42  ;;  %v2000_v24 = vpop.f32.mrb[15].mxu1 }
 0xa72   : > { %1642 = vst.msk [vmem:[%s2417_s16] sm:$0xff] %vm610_vm1, %v1641_v23 }
 0xa73   : > { %2127 = shalt.err (!%p2124_p8)
}
 0xa74   : > { %s2128_s16 = scalar_lea.hbm %s2566_s27, 128  ;;  %s2132_s12 = scalar_lea.hbm %s2682_s4, 256 }
 0xa75   : > { %p2129_p10 = scmp.ne.s32.totalorder %s2566_s27, %s2128_s16  ;;  %p2133_p13 = scmp.lt.u32.totalorder %s2566_s27, %s2682_s4 }
 0xa76   : > { %p2134_p0 = scmp.lt.u32.totalorder %s2132_s12, %s2128_s16  ;;  %p2136_p2 = scmp.lt.u32.totalorder %s2128_s16, %s2566_s27 }
 0xa77   : > { %p2130_p11 = pnand %p2129_p10, %p2335_p3 }
 0xa78   : > { %p2135_p1 = por %p2134_p0, %p2133_p13 }
 0xa79   : > { %p2131_p12 = pneg %p2130_p11 }
 0xa7a   : > { %p2137_p4 = por %p2136_p2, %p2135_p1 }
 0xa7c   : > { %p2138_p5 = pnand %p2137_p4, %p2131_p12 }
 0xa7e   : > { %2141 = shalt.err (!%p2138_p5)
}
 0xa7f   : > { %2001 = dma.vmem_to_hbm [thread:$0]  (%p2335_p3), %s2568_s17, 128, %s2566_s27, %s1644_s21  }
 0xa80 PF: > { %s2684_s26 = sld [smem:[#allocation13_spill]]  ;;  %s2685_s25 = sld [smem:[#allocation6_spill]] }
 0xa86   : > { %p2007_p6 = scmp.ge.s32.totalorder %s2684_s26, 2  ;;  %s1669_s20 = sand.u32 1, %s2685_s25  }
 0xa87   : > { %s1670_s18 = scalar_lea.sflag [#allocation4], %s1669_s20 }
 0xa88   : > { %p2004_p7 = pnand %p2007_p6, %p2345_p9 }
 0xa8a   : > { %2175 = dma.done.wait (!%p2004_p7), %s1670_s18, 128  }
 0xa8b   : > { %2177 = vsyncadd (!%p2004_p7), %s1670_s18, 4294967168  ;;  %s25_s28 = sadd.s32 1, %s2684_s26   ;;  %s2687_s21 = sld [smem:[#allocation7_spill]] }
 0xa8c   : > { %p22_p8 = scmp.ge.s32.totalorder %s25_s28, 6   ;;  %s2688_s22 = sld [smem:[#allocation8_spill]] }
 0xa8d   : > { %s2689_s23 = sld [smem:[#allocation18_spill]]  ;;  %s2690_s24 = sld [smem:[#allocation11_spill]] }
 0xa8e   : > { %s2691_s25 = sld [smem:[#allocation12_spill]]  ;;  %s2692_s26 = sld [smem:[#allocation14_spill]] }
 0xa8f   : > { %s2693_s27 = sld [smem:[#allocation16_spill]]  ;;  %24 = sbr.rel (!%p22_p8) target bundleno = 10 (0xa), region = 140 }
 0xa96   :  { %1675 = vsyncpa [#allocation4], 1 }
 0xa97   :  { %1677 = vsyncpa [#allocation4 + $0x1], 1 }

</bundles_post_ra>
